<compile_context>
chip_gen: v7x
topology: tpu7x:2x2x1
jax: 0.10.0
libtpu: 0.0.40
codegen_flags: <defaults>
</compile_context>

<pallas_src>
import jax
import jax.numpy as jnp
from jax.experimental import pallas as pl
from jax.experimental.pallas import tpu as pltpu


def _round_up(x, m):
    return ((x + m - 1) // m) * m


# ----------------------------------------------------------------------------
# Pallas kernel: fused multi-layer perceptron forward pass
# ----------------------------------------------------------------------------
def _make_mlp_kernel(n_layers):
    """Kernel for a fixed number of Linear layers.

    ref layout: (x_ref, w0_ref, b0_ref, w1_ref, b1_ref, ..., out_ref)
    x/out are batch-tiled; weights/biases are full-array constant-index blocks.
    """

    def kernel(*refs):
        x_ref = refs[0]
        out_ref = refs[-1]
        h = x_ref[...]  # f32 already; no casts (bf16 weights would be an option on v6e/v7x)
        for i in range(n_layers):
            w = refs[1 + 2 * i][...]   # (in, out)
            b = refs[2 + 2 * i][...]   # (1, out)
            h = jnp.dot(h, w, preferred_element_type=jnp.float32) + b
            if i < n_layers - 1:
                h = jnp.maximum(h, 0.0)
                # TODO(synk): nn.Dropout omitted (inference/eval semantics -> identity)
        out_ref[...] = h.astype(out_ref.dtype)

    return kernel


def mlp_forward(x2d, prepared_params, d_out_padded, *, block_batch=512):
    """x2d: (B, D_in) f32 (contiguous reshape of X, NO transpose needed).

    prepared_params: list of (W (in,out), b (out,)) with the first W row-permuted to
    absorb the swapaxes(1,2) and the last W/b zero-padded to d_out_padded lanes.
    """
    n_layers = len(prepared_params)
    B, d_in = x2d.shape

    # Tile the batch. If B <= block_batch use a single full block (block dims equal the
    # array dims, always layout-legal); otherwise 512-row blocks (partial last tile is
    # masked by Pallas on writeback, and rows are independent so tail rows are safe).
    TB = B if B <= block_batch else block_batch
    nb = pl.cdiv(B, TB)

    kernel = _make_mlp_kernel(n_layers)

    flat_inputs = [x2d]
    in_specs = [pl.BlockSpec((TB, d_in), lambda i: (i, 0))]
    for (w, b) in prepared_params:
        b2 = b.reshape(1, -1)
        flat_inputs.append(w)
        in_specs.append(pl.BlockSpec(w.shape, lambda i: (0, 0)))   # resident in VMEM
        flat_inputs.append(b2)
        in_specs.append(pl.BlockSpec(b2.shape, lambda i: (0, 0)))  # resident in VMEM

    flops = 2 * B * sum(int(w.shape[0]) * int(w.shape[1]) for w, _ in prepared_params)
    bytes_accessed = 4 * (x2d.size + B * d_out_padded
                          + sum(int(w.size) + int(b.size) for w, b in prepared_params))

    out = pl.pallas_call(
        kernel,
        out_shape=jax.ShapeDtypeStruct((B, d_out_padded), jnp.float32),
        grid=(nb,),
        in_specs=in_specs,
        out_specs=pl.BlockSpec((TB, d_out_padded), lambda i: (i, 0)),
        compiler_params=pltpu.CompilerParams(dimension_semantics=("parallel",)),
        cost_estimate=pl.CostEstimate(flops=flops, transcendentals=0,
                                      bytes_accessed=bytes_accessed),
    )(*flat_inputs)
    return out


# ----------------------------------------------------------------------------
# Model wrapper mirroring DNN_model
# ----------------------------------------------------------------------------
class SeqGenCfg:
    """Minimal stand-in for the seq_gen object (only the fields forward uses)."""

    def __init__(self, input_columns_idx, input_width, output_columns_idx, output_width):
        self.input_columns_idx = input_columns_idx
        self.input_width = input_width
        self.output_columns_idx = output_columns_idx
        self.output_width = output_width


class DNNModelPallas:
    def __init__(self, seq_gen, hidden_list, key, dropout=0.3, block_batch=512):
        self.seq_gen = seq_gen
        self.hidden_list = list(hidden_list)
        self.block_batch = int(block_batch)
        self.input_shape = int(len(seq_gen.input_columns_idx) * seq_gen.input_width)
        self.output_shape = int(len(seq_gen.output_columns_idx) * seq_gen.output_width)
        self.d_out_padded = _round_up(self.output_shape, 128)

        dims = [self.input_shape] + self.hidden_list + [self.output_shape]
        self.params = []  # PyTorch-semantics params: first Linear expects swapaxes'd input
        for i in range(len(dims) - 1):
            key, kw, kb = jax.random.split(key, 3)
            fan_in = dims[i]
            bound = 1.0 / jnp.sqrt(fan_in)
            w = jax.random.uniform(kw, (dims[i], dims[i + 1]), jnp.float32, -bound, bound)
            b = jax.random.uniform(kb, (dims[i + 1],), jnp.float32, -bound, bound)
            self.params.append((w, b))

        self.prepared_params = self._prepare_kernel_params()

    def _prepare_kernel_params(self):
        """One-time weight massaging (tiny, done at init, not per call):
        * fold X.swapaxes(1,2) into a row permutation of W0 so the kernel can take
          X.reshape(B, W*C) directly (no HBM transpose copy of X);
        * zero-pad the last layer to 128 output lanes for dense (unmasked) stores.
        """
        C = len(self.seq_gen.input_columns_idx)
        W = self.seq_gen.input_width
        prepared = []
        n = len(self.params)
        for i, (w, b) in enumerate(self.params):
            if i == 0:
                h0 = w.shape[1]
                # original rows indexed by c*W + w  ->  new rows indexed by w*C + c
                w = w.reshape(C, W, h0).transpose(1, 0, 2).reshape(W * C, h0)
            if i == n - 1:
                pad = self.d_out_padded - w.shape[1]
                if pad > 0:
                    w = jnp.pad(w, ((0, 0), (0, pad)))
                    b = jnp.pad(b, ((0, pad),))
            prepared.append((w, b))
        return prepared

    def __call__(self, X):
        # X: (batch, input_width, n_input_cols)
        B = X.shape[0]
        x2d = X.reshape(B, self.input_shape)  # contiguous reshape, no transpose copy
        y = mlp_forward(x2d, self.prepared_params, self.d_out_padded,
                        block_batch=self.block_batch)
        y = y[:, :self.output_shape]
        return y.reshape(-1, self.seq_gen.output_width, len(self.seq_gen.output_columns_idx))


# ----------------------------------------------------------------------------
# Pure-JAX reference (uses the ORIGINAL PyTorch-semantics params + swapaxes path)
# ----------------------------------------------------------------------------
def reference_forward(model, X):
    h = jnp.swapaxes(X, 1, 2).reshape(-1, model.input_shape)
    for i, (w, b) in enumerate(model.params):
        h = h @ w + b
        if i < len(model.params) - 1:
            h = jnp.maximum(h, 0.0)
    return h.reshape(-1, model.seq_gen.output_width, len(model.seq_gen.output_columns_idx))


if __name__ == "__main__":
    key = jax.random.PRNGKey(0)
    k_model, k_x = jax.random.split(key)

    seq_gen = SeqGenCfg(
        input_columns_idx=[0, 1, 2, 3],   # 4 input columns
        input_width=8,                    # -> input_shape = 32
        output_columns_idx=[0, 1],        # 2 output columns
        output_width=4,                   # -> output_shape = 8
    )
    hidden_list = [32, 32]

    model = DNNModelPallas(seq_gen, hidden_list, k_model)

    batch = 2
    X = jax.random.normal(k_x, (batch, seq_gen.input_width, len(seq_gen.input_columns_idx)),
                          dtype=jnp.float32)

    y = model(X)
    y = jax.block_until_ready(y)

    y_ref = reference_forward(model, X)
    assert y.shape == (batch, seq_gen.output_width, len(seq_gen.output_columns_idx))
    assert jnp.allclose(y, y_ref, atol=1e-5, rtol=1e-5)

    print("KERNEL_OK")
</pallas_src>

<mosaic_0001>
module attributes {stable_mosaic.version = 11 : i64} {
  func.func @kernel(%arg0: i32, %arg1: memref<2x32xf32, #tpu.memory_space<vmem>>, %arg2: memref<32x32xf32, #tpu.memory_space<vmem>>, %arg3: memref<1x32xf32, #tpu.memory_space<vmem>>, %arg4: memref<32x32xf32, #tpu.memory_space<vmem>>, %arg5: memref<1x32xf32, #tpu.memory_space<vmem>>, %arg6: memref<32x128xf32, #tpu.memory_space<vmem>>, %arg7: memref<1x128xf32, #tpu.memory_space<vmem>>, %arg8: memref<2x128xf32, #tpu.memory_space<vmem>>) attributes {dimension_semantics = [#tpu.dimension_semantics<parallel>], iteration_bounds = array<i64: 1>, scalar_prefetch = 0 : i64, scratch_operands = 0 : i64, tpu.core_type = #tpu.core_type<tc>, window_params = [{transform_indices = @transform_0, window_bounds = array<i64: 2, 32>}, {pipeline_mode = #tpu.pipeline_mode<synchronous>, transform_indices = @transform_1, window_bounds = array<i64: 32, 32>}, {pipeline_mode = #tpu.pipeline_mode<synchronous>, transform_indices = @transform_2, window_bounds = array<i64: 1, 32>}, {pipeline_mode = #tpu.pipeline_mode<synchronous>, transform_indices = @transform_3, window_bounds = array<i64: 32, 32>}, {pipeline_mode = #tpu.pipeline_mode<synchronous>, transform_indices = @transform_4, window_bounds = array<i64: 1, 32>}, {pipeline_mode = #tpu.pipeline_mode<synchronous>, transform_indices = @transform_5, window_bounds = array<i64: 32, 128>}, {pipeline_mode = #tpu.pipeline_mode<synchronous>, transform_indices = @transform_6, window_bounds = array<i64: 1, 128>}, {transform_indices = @transform_7, window_bounds = array<i64: 2, 128>}]} {
    %c0 = arith.constant 0 : index
    %c0_0 = arith.constant 0 : index
    %0 = vector.load %arg1[%c0, %c0_0] : memref<2x32xf32, #tpu.memory_space<vmem>>, vector<2x32xf32>
    %c0_1 = arith.constant 0 : index
    %c0_2 = arith.constant 0 : index
    %1 = vector.load %arg2[%c0_1, %c0_2] : memref<32x32xf32, #tpu.memory_space<vmem>>, vector<32x32xf32>
    %c0_3 = arith.constant 0 : index
    %c0_4 = arith.constant 0 : index
    %2 = vector.load %arg3[%c0_3, %c0_4] : memref<1x32xf32, #tpu.memory_space<vmem>>, vector<1x32xf32>
    %cst = arith.constant dense<0.000000e+00> : vector<2x32xf32>
    %3 = tpu.matmul %0, %1, %cst {dimension_numbers = #tpu.dot_dimension_numbers<[1], [0], [0], [1], [0, 0, 1, 1], [], []>} : vector<2x32xf32>, vector<32x32xf32>, vector<2x32xf32> -> vector<2x32xf32>
    %4 = vector.broadcast %2 : vector<1x32xf32> to vector<2x32xf32>
    %5 = arith.addf %3, %4 : vector<2x32xf32>
    %cst_5 = arith.constant 0.000000e+00 : f32
    %6 = vector.broadcast %cst_5 : f32 to vector<2x32xf32>
    %7 = arith.maximumf %5, %6 : vector<2x32xf32>
    %c0_6 = arith.constant 0 : index
    %c0_7 = arith.constant 0 : index
    %8 = vector.load %arg4[%c0_6, %c0_7] : memref<32x32xf32, #tpu.memory_space<vmem>>, vector<32x32xf32>
    %c0_8 = arith.constant 0 : index
    %c0_9 = arith.constant 0 : index
    %9 = vector.load %arg5[%c0_8, %c0_9] : memref<1x32xf32, #tpu.memory_space<vmem>>, vector<1x32xf32>
    %cst_10 = arith.constant dense<0.000000e+00> : vector<2x32xf32>
    %10 = tpu.matmul %7, %8, %cst_10 {dimension_numbers = #tpu.dot_dimension_numbers<[1], [0], [0], [1], [0, 0, 1, 1], [], []>} : vector<2x32xf32>, vector<32x32xf32>, vector<2x32xf32> -> vector<2x32xf32>
    %11 = vector.broadcast %9 : vector<1x32xf32> to vector<2x32xf32>
    %12 = arith.addf %10, %11 : vector<2x32xf32>
    %cst_11 = arith.constant 0.000000e+00 : f32
    %13 = vector.broadcast %cst_11 : f32 to vector<2x32xf32>
    %14 = arith.maximumf %12, %13 : vector<2x32xf32>
    %c0_12 = arith.constant 0 : index
    %c0_13 = arith.constant 0 : index
    %15 = vector.load %arg6[%c0_12, %c0_13] : memref<32x128xf32, #tpu.memory_space<vmem>>, vector<32x128xf32>
    %c0_14 = arith.constant 0 : index
    %c0_15 = arith.constant 0 : index
    %16 = vector.load %arg7[%c0_14, %c0_15] : memref<1x128xf32, #tpu.memory_space<vmem>>, vector<1x128xf32>
    %cst_16 = arith.constant dense<0.000000e+00> : vector<2x128xf32>
    %17 = tpu.matmul %14, %15, %cst_16 {dimension_numbers = #tpu.dot_dimension_numbers<[1], [0], [0], [1], [0, 0, 1, 1], [], []>} : vector<2x32xf32>, vector<32x128xf32>, vector<2x128xf32> -> vector<2x128xf32>
    %18 = vector.broadcast %16 : vector<1x128xf32> to vector<2x128xf32>
    %19 = arith.addf %17, %18 : vector<2x128xf32>
    %c0_17 = arith.constant 0 : index
    %c0_18 = arith.constant 0 : index
    %20 = vector.load %arg8[%c0_17, %c0_18] : memref<2x128xf32, #tpu.memory_space<vmem>>, vector<2x128xf32>
    tpu.vector_store %arg8[%c0_17, %c0_18], %19 {strides = array<i32>} : memref<2x128xf32, #tpu.memory_space<vmem>>, vector<2x128xf32>,
    return
  }
  func.func @transform_0(%arg0: i32) -> (i32, i32) {
    %c0_i32 = arith.constant 0 : i32
    %c0_i32_0 = arith.constant 0 : i32
    return %arg0, %c0_i32 : i32, i32
  }
  func.func @transform_1(%arg0: i32) -> (i32, i32) {
    %c0_i32 = arith.constant 0 : i32
    %c0_i32_0 = arith.constant 0 : i32
    %c0_i32_1 = arith.constant 0 : i32
    return %c0_i32, %c0_i32_0 : i32, i32
  }
  func.func @transform_2(%arg0: i32) -> (i32, i32) {
    %c0_i32 = arith.constant 0 : i32
    %c0_i32_0 = arith.constant 0 : i32
    %c0_i32_1 = arith.constant 0 : i32
    return %c0_i32, %c0_i32_0 : i32, i32
  }
  func.func @transform_3(%arg0: i32) -> (i32, i32) {
    %c0_i32 = arith.constant 0 : i32
    %c0_i32_0 = arith.constant 0 : i32
    %c0_i32_1 = arith.constant 0 : i32
    return %c0_i32, %c0_i32_0 : i32, i32
  }
  func.func @transform_4(%arg0: i32) -> (i32, i32) {
    %c0_i32 = arith.constant 0 : i32
    %c0_i32_0 = arith.constant 0 : i32
    %c0_i32_1 = arith.constant 0 : i32
    return %c0_i32, %c0_i32_0 : i32, i32
  }
  func.func @transform_5(%arg0: i32) -> (i32, i32) {
    %c0_i32 = arith.constant 0 : i32
    %c0_i32_0 = arith.constant 0 : i32
    %c0_i32_1 = arith.constant 0 : i32
    return %c0_i32, %c0_i32_0 : i32, i32
  }
  func.func @transform_6(%arg0: i32) -> (i32, i32) {
    %c0_i32 = arith.constant 0 : i32
    %c0_i32_0 = arith.constant 0 : i32
    %c0_i32_1 = arith.constant 0 : i32
    return %c0_i32, %c0_i32_0 : i32, i32
  }
  func.func @transform_7(%arg0: i32) -> (i32, i32) {
    %c0_i32 = arith.constant 0 : i32
    %c0_i32_0 = arith.constant 0 : i32
    return %arg0, %c0_i32 : i32, i32
  }
}

</mosaic_0001>

<bundles_post_ra>
// kernel: tpu_custom_call.1
= control target key start
LH: loop header
LB: loop body
LE: loop exit
PB: predicated region body
PF: predicated region fallthrough
CT: control target
= control target key end

     0   :  { %12 = vsyncpa [#allocation3], 0  ;;  %s688_s0 = inlined_call_operand.hbm [shape: f32[2,32], index: 0, kind: input, shape index: {}]   ;;  %s689_s1 = inlined_call_operand.hbm [shape: f32[32,32], index: 1, kind: input, shape index: {}]   ;;  %s690_s2 = inlined_call_operand.vmem [shape: f32[1,32], index: 2, kind: input, shape index: {}]   ;;  %s691_s3 = inlined_call_operand.hbm [shape: f32[32,32], index: 3, kind: input, shape index: {}]   ;;  %s692_s4 = inlined_call_operand.vmem [shape: f32[1,32], index: 4, kind: input, shape index: {}]   ;;  %s693_s5 = inlined_call_operand.hbm [shape: f32[32,128], index: 5, kind: input, shape index: {}]   ;;  %s694_s6 = inlined_call_operand.vmem [shape: f32[1,128], index: 6, kind: input, shape index: {}]   ;;  %s695_s7 = inlined_call_operand.hbm [shape: f32[2,128], index: 7, kind: output, shape index: {}]  }
   0x1   :  { %13 = vsyncpa [#allocation6], 0 }
   0x2   :  { %14 = vsyncpa [#allocation9], 0 }
   0x3   :  { %15 = vsyncpa [#allocation4], 0  ;;  %s554_s24 = smov [#allocation5]   ;;  %s436_s28 = scalar_lea.hbm %s689_s1, 512 }
   0x4   :  { %s31_s25 = sshll.u32 %s554_s24, 4  ;;  %p437_p0 = scmp.ne.s32.totalorder %s689_s1, %s436_s28  ;;  %s32_s25 = int_to_ptr.vmem [resolvable:$true] %s31_s25 }
   0x5   :  { %p440_p1 = scmp.lt.u32.totalorder %s436_s28, %s689_s1 }
   0x7   :  { %p442_p2 = pnand %p440_p1, %p437_p0 }
   0x9   :  { %445 = shalt.err (!%p442_p2)
}
   0xa   :  { %s446_s10 = scalar_lea.vmem %s32_s25, 512  ;;  %p451_p4 = scmp.lt.s32.totalorder %s32_s25, %s32_s25 }
   0xb   :  { %p447_p3 = scmp.ne.s32.totalorder %s32_s25, %s446_s10  ;;  %p452_p5 = scmp.lt.s32.totalorder %s446_s10, %s446_s10 }
   0xd   :  { %p453_p6 = por %p452_p5, %p451_p4 }
   0xf   :  { %p454_p7 = pnand %p453_p6, %p447_p3 }
  0x11   :  { %457 = shalt.err (!%p454_p7)
}
  0x12   :  { %s555_s11 = smov 128   ;;  %s556_s12 = smov 8  }
  0x13   :  { %37 = dma.hbm_to_vmem [thread:$0]  %s689_s1, 512, %s32_s25, [#allocation6], %s555_s11, %s555_s11, %s556_s12  }
  0x14   :  { %s557_s15 = smov [#allocation2]   ;;  %s558_s17 = smov [#allocation7]  }
  0x15   :  { %s22_s16 = sshll.u32 %s557_s15, 4  ;;  %s45_s18 = sshll.u32 %s558_s17, 4  ;;  %s23_s16 = int_to_ptr.vmem [resolvable:$true] %s22_s16  ;;  %s46_s18 = int_to_ptr.vmem [resolvable:$true] %s45_s18 }
  0x16   :  { %s458_s21 = scalar_lea.hbm %s688_s0, 32 }
  0x17   :  { %p459_p8 = scmp.ne.s32.totalorder %s688_s0, %s458_s21  ;;  %p462_p9 = scmp.lt.u32.totalorder %s458_s21, %s688_s0 }
  0x19   :  { %p464_p10 = pnand %p462_p9, %p459_p8 }
  0x1b   :  { %467 = shalt.err (!%p464_p10)
}
  0x1c   :  { %s468_s1 = scalar_lea.vmem %s23_s16, 32  ;;  %p473_p12 = scmp.lt.s32.totalorder %s23_s16, %s23_s16 }
  0x1d   :  { %p469_p11 = scmp.ne.s32.totalorder %s23_s16, %s468_s1  ;;  %p474_p13 = scmp.lt.s32.totalorder %s468_s1, %s468_s1 }
  0x1f   :  { %p475_p0 = por %p474_p13, %p473_p12 }
  0x21   :  { %p476_p1 = pnand %p475_p0, %p469_p11 }
  0x23   :  { %479 = shalt.err (!%p476_p1)
}
  0x24   :  { %25 = dma.hbm_to_vmem [thread:$0]  %s688_s0, 32, %s23_s16, [#allocation3]  }
  0x25   :  { %s480_s30 = scalar_lea.hbm %s691_s3, 512 }
  0x26   :  { %p481_p2 = scmp.ne.s32.totalorder %s691_s3, %s480_s30  ;;  %p484_p3 = scmp.lt.u32.totalorder %s480_s30, %s691_s3 }
  0x28   :  { %p486_p4 = pnand %p484_p3, %p481_p2 }
  0x2a   :  { %489 = shalt.err (!%p486_p4)
}
  0x2b   :  { %s490_s14 = scalar_lea.vmem %s46_s18, 512  ;;  %p495_p6 = scmp.lt.s32.totalorder %s46_s18, %s46_s18 }
  0x2c   :  { %p491_p5 = scmp.ne.s32.totalorder %s46_s18, %s490_s14  ;;  %p496_p7 = scmp.lt.s32.totalorder %s490_s14, %s490_s14 }
  0x2e   :  { %p497_p8 = por %p496_p7, %p495_p6 }
  0x30   :  { %p498_p9 = pnand %p497_p8, %p491_p5 }
  0x32   :  { %501 = shalt.err (!%p498_p9)
}
  0x33   :  { %51 = dma.hbm_to_vmem [thread:$0]  %s691_s3, 512, %s46_s18, [#allocation6], %s555_s11, %s555_s11, %s556_s12  }
  0x34   :  { %s559_s16 = smov [#allocation8]   ;;  %s502_s21 = scalar_lea.hbm %s693_s5, 512 }
  0x35   :  { %s59_s17 = sshll.u32 %s559_s16, 4  ;;  %p503_p10 = scmp.ne.s32.totalorder %s693_s5, %s502_s21  ;;  %s60_s17 = int_to_ptr.vmem [resolvable:$true] %s59_s17 }
  0x36   :  { %p506_p11 = scmp.lt.u32.totalorder %s502_s21, %s693_s5 }
  0x38   :  { %p508_p12 = pnand %p506_p11, %p503_p10 }
  0x3a   :  { %511 = shalt.err (!%p508_p12)
}
  0x3b   :  { %s512_s1 = scalar_lea.vmem %s60_s17, 512  ;;  %p517_p0 = scmp.lt.s32.totalorder %s60_s17, %s60_s17 }
  0x3c   :  { %p513_p13 = scmp.ne.s32.totalorder %s60_s17, %s512_s1  ;;  %p518_p1 = scmp.lt.s32.totalorder %s512_s1, %s512_s1 }
  0x3e   :  { %p519_p2 = por %p518_p1, %p517_p0 }
  0x40   :  { %p520_p3 = pnand %p519_p2, %p513_p13 }
  0x42   :  { %523 = shalt.err (!%p520_p3)
}
  0x43   :  { %65 = dma.hbm_to_vmem [thread:$0]  %s693_s5, 512, %s60_s17, [#allocation9], %s555_s11, %s555_s11, %s556_s12  }
  0x44   :  { %546 = dma.done.wait [#allocation3], 32  }
  0x45   :  { %547 = vsyncadd [#allocation3], 4294967264 }
  0x46   :  { %548 = dma.done.wait [#allocation6], 1024  }
  0x47   :  { %549 = vsyncadd [#allocation6], 4294966272 }
  0x48   :  { %550 = dma.done.wait [#allocation9], 512  }
  0x49   :  { %551 = vsyncadd [#allocation9], 4294966784  ;;  %v560_v0 = vmov 0.0|0.0   ;;  %vm561_vm0 = vmmov 0   ;;  %v562_v1 = vmov 0.0   ;;  %v81_v2 = vld [vmem:[#allocation5] sm:$0xff] }
  0x4a   :  { %408 = vmatprep.subr.bf16.mxu0 %v560_v0  ;;  %383 = vmatprep.mubr.msk.f32.mxu0 %vm561_vm0, %v562_v1  ;;  %v82_v3 = vld [vmem:[#allocation5 + $0x8] sm:$0xff]  ;;  %v83_v4 = vld [vmem:[#allocation5 + $0x10] sm:$0xff]  ;;  %v84_v6 = vld [vmem:[#allocation5 + $0x18] sm:$0xff]  ;;  %vm92_vm1 = vcmask 261120   ;;  %s563_s28 = smov [#allocation10]  }
  0x4b   :  { %414 = vmatprep.subr.bf16.mxu1 %v560_v0  ;;  %394 = vmatprep.mubr.msk.f32.mxu1 %vm561_vm0, %v562_v1  ;;  %v409_v5 = vpack.c.bf16 %v82_v3, %v81_v2  ;;  %v167_v7 = vld [vmem:[#allocation7] sm:$0xff]  ;;  %v168_v8 = vld [vmem:[#allocation7 + $0x8] sm:$0xff]  ;;  %v412_v9 = vpack.c.bf16 %v84_v6, %v83_v4  ;;  %v80_v11 = vld [vmem:[#allocation2] sm:$0x3]  ;;  %s343_s29 = sshll.u32 %s563_s28, 4  ;;  %s344_s29 = int_to_ptr.vmem [resolvable:$true] %s343_s29 }
  0x4c   :  { %v415_v10 = vpack.c.bf16 %v168_v8, %v167_v7  ;;  %v169_v12 = vld [vmem:[#allocation7 + $0x10] sm:$0xff]  ;;  %v170_v13 = vld [vmem:[#allocation7 + $0x18] sm:$0xff]  ;;  %v252_v15 = vld [vmem:[#allocation8] sm:$0xff]  ;;  %s524_s30 = scalar_lea.vmem %s344_s29, 32  ;;  %p529_p5 = scmp.lt.s32.totalorder %s344_s29, %s344_s29 }
  0x4d   :  { %410 = vmatpush3.bf16.msra.mxu0 %v409_v5  ;;  %v418_v14 = vpack.c.bf16 %v170_v13, %v169_v12  ;;  %v253_v16 = vld [vmem:[#allocation8 + $0x8] sm:$0xff]  ;;  %v354_v18 = vld [vmem:[%s690_s2] ss:$0 sm:$0xff]  ;;  %v254_v23 = vld [vmem:[#allocation8 + $0x10] sm:$0xff]  ;;  %p525_p4 = scmp.ne.s32.totalorder %s344_s29, %s524_s30  ;;  %p530_p6 = scmp.lt.s32.totalorder %s524_s30, %s524_s30 }
  0x4e   :  { %411 = vmatprep.subr.bf16.mxu0 %v560_v0  ;;  %416 = vmatpush3.bf16.msra.mxu1 %v415_v10  ;;  %v421_v17 = vpack.c.bf16 %v253_v16, %v252_v15  ;;  %v255_v24 = vld [vmem:[#allocation8 + $0x18] sm:$0xff] }
  0x4f   :  { %417 = vmatprep.subr.bf16.mxu1 %v560_v0  ;;  %v424_v25 = vpack.c.bf16 %v255_v24, %v254_v23  ;;  %v356_v26 = vld [vmem:[%s692_s4] ss:$0 sm:$0xff]  ;;  %p531_p7 = por %p530_p6, %p529_p5 }
  0x50   :  { %v358_v31 = vld [vmem:[%s694_s6] ss:$0 sm:$0xff] }
  0x51   :  { %413 = vmatpush3.bf16.msra.mxu0 %v412_v9  ;;  %p532_p8 = pnand %p531_p7, %p525_p4 }
  0x52   :  { %420 = vmatprep.subr.bf16.mxu0 %v560_v0  ;;  %419 = vmatpush3.bf16.msra.mxu1 %v418_v14 }
  0x54   :  { %384 = vmatmul.mubr.msk.f32.vlgmr.msra.gmra.mrb[0].mxu0 %vm92_vm1, %v80_v11 }
  0x55   :  { %405 = vmatprep.mubr.msk.f32.mxu0 %vm561_vm0, %v562_v1  ;;  %422 = vmatpush3.bf16.msra.mxu0 %v421_v17 }
  0x56   :  { %423 = vmatprep.subr.bf16.mxu0 %v560_v0 }
  0x59   :  { %425 = vmatpush3.bf16.msra.mxu0 %v424_v25 }
 0x127   :  { %v162_v19 = vpop.f32.mrb[0].mxu0 }
 0x128   :  { %v163_v20 = vadd.f32 %v354_v18, %v162_v19  ;;  %v385_v21 = vpop.f32.mrb[1].mxu0 }
 0x12a   :  { %v166_v22 = vmax.f32 %v163_v20, 0.0 }
 0x12c   :  { %395 = vmatmul.mubr.msk.f32.vlgmr.msra.gmra.mrb[0].mxu1 %vm92_vm1, %v166_v22 }
 0x1ff   :  { %v247_v27 = vpop.f32.mrb[0].mxu1 }
 0x200   :  { %v248_v28 = vadd.f32 %v356_v26, %v247_v27  ;;  %v396_v29 = vpop.f32.mrb[1].mxu1 }
 0x202   :  { %v251_v30 = vmax.f32 %v248_v28, 0.0 }
 0x204   :  { %406 = vmatmul.mubr.msk.f32.vlgmr.msra.gmra.mrb[2].mxu0 %vm92_vm1, %v251_v30 }
 0x2d7   :  { %v332_v32 = vpop.f32.mrb[2].mxu0 }
 0x2d8   :  { %v333_v33 = vadd.f32 %v358_v31, %v332_v32  ;;  %v407_v34 = vpop.f32.mrb[3].mxu0 }
 0x2da   :  { %336 = vst [vmem:[#allocation10] sm:$0x3] %v333_v33 }
 0x2db   :  { %535 = shalt.err (!%p532_p8)
}
 0x2dc   :  { %s536_s9 = scalar_lea.hbm %s695_s7, 32 }
 0x2dd   :  { %p537_p9 = scmp.ne.s32.totalorder %s695_s7, %s536_s9  ;;  %p540_p10 = scmp.lt.u32.totalorder %s536_s9, %s695_s7 }
 0x2df   :  { %p542_p11 = pnand %p540_p10, %p537_p9 }
 0x2e1   :  { %545 = shalt.err (!%p542_p11)
}
 0x2e2   :  { %346 = dma.vmem_to_hbm [thread:$0]  %s344_s29, 32, %s695_s7, [#allocation4]  }
 0x2e3   :  { %552 = dma.done.wait [#allocation4], 32  }
 0x2e4   :  { %553 = vsyncadd [#allocation4], 4294967264 }
 0x2e5   :  { %350 = vsyncpa [#allocation3], 1 }
 0x2e6   :  { %351 = vsyncpa [#allocation6], 1 }
 0x2e7   :  { %352 = vsyncpa [#allocation9], 1 }
 0x2e8   :  { %353 = vsyncpa [#allocation4], 1 }

</bundles_post_ra>
